<compile_context>
chip_gen: v7x
topology: tpu7x:2x2x1
jax: 0.10.0
libtpu: 0.0.40
codegen_flags: <defaults>
</compile_context>

<pallas_src>
import functools

import jax
import jax.numpy as jnp
from jax.experimental import pallas as pl
from jax.experimental.pallas import tpu as pltpu


LANE = 128      # lane-dense padded fc3 output width
SUBLANE = 8     # f32 sublane alignment for the batch tile
TB_CAP = 1024   # max batch rows per grid step (~13 MiB VMEM footprint)


def _round_up(x, m):
    return ((x + m - 1) // m) * m


def _cdiv(a, b):
    return -(-a // b)


def mlp_head_kernel(x_ref, w1_ref, b1_ref, w2_ref, b2_ref, w3_ref, b3_ref,
                    o_ref):
    """Fused fc1 -> ReLU -> fc2 -> ReLU -> fc3 on a [TB, 768] CLS tile.

    x arrives in f32 (no wrapper-side cast/copy) and is cast to bf16 in-kernel
    for the MXU; accumulation is f32, bias-add and ReLU are f32.  The fc3
    output is lane-padded to 128 columns.
    """
    x = x_ref[...].astype(jnp.bfloat16)                   # [TB, 768]

    # fc1 + ReLU  (768 -> 512)
    h1 = jnp.dot(x, w1_ref[...], preferred_element_type=jnp.float32)
    h1 = jnp.maximum(h1 + b1_ref[...], 0.0)               # f32
    # dropout(p=0.2): identity in eval mode.

    # fc2 + ReLU  (512 -> 256)
    h2 = jnp.dot(h1.astype(jnp.bfloat16), w2_ref[...],
                 preferred_element_type=jnp.float32)
    h2 = jnp.maximum(h2 + b2_ref[...], 0.0)               # f32
    # dropout(p=0.2): identity in eval mode.

    # fc3  (256 -> 128 padded; real logits live in the first num_labels cols)
    logits = jnp.dot(h2.astype(jnp.bfloat16), w3_ref[...],
                     preferred_element_type=jnp.float32)
    o_ref[...] = (logits + b3_ref[...]).astype(o_ref.dtype)


def prepare_head_params(w1, b1, w2, b2, w3, b3):
    """One-time parameter prep: bf16 weights, f32 biases, fc3 lane-padded."""
    num_labels = w3.shape[1]
    n_pad = _round_up(max(num_labels, LANE), LANE)
    w3p = jnp.pad(w3, ((0, 0), (0, n_pad - num_labels))).astype(jnp.bfloat16)
    b3p = jnp.pad(b3.astype(jnp.float32), ((0, 0), (0, n_pad - num_labels)))
    return (w1.astype(jnp.bfloat16), b1.astype(jnp.float32),
            w2.astype(jnp.bfloat16), b2.astype(jnp.float32),
            w3p, b3p)


@functools.partial(jax.jit, static_argnames=("num_labels",))
def bert_arch_head(cls_emb, w1b, b1f, w2b, b2f, w3p, b3p, *, num_labels):
    """Run the fused classifier head as a batch-tiled Pallas call."""
    B = cls_emb.shape[0]
    n_pad = w3p.shape[1]

    # Keep x in f32; only pad the batch to a sublane multiple when needed
    # (cheap, and usually a no-op for real batch sizes).
    x = cls_emb.astype(jnp.float32)
    if B % SUBLANE:
        x = jnp.pad(x, ((0, SUBLANE - B % SUBLANE), (0, 0)))
    B_pad = x.shape[0]

    # Tile ~half the batch per step (>= 2 grid steps when possible so v7x's
    # two TensorCores both get work), capped at TB_CAP.  Pallas masks the
    # ragged last block, so no round-up of B to a multiple of TB.
    TB = min(TB_CAP, max(SUBLANE, _round_up(_cdiv(B_pad, 2), SUBLANE)))
    grid = (_cdiv(B_pad, TB),)

    flops = 2 * B_pad * (768 * 512 + 512 * 256 + 256 * n_pad)
    w_bytes = 2 * (768 * 512 + 512 * 256 + 256 * n_pad) + 4 * (512 + 256 + n_pad)
    bytes_accessed = 4 * B_pad * (768 + n_pad) + w_bytes

    resident = lambda shape: pl.BlockSpec(shape, lambda i: (0, 0))

    out_padded = pl.pallas_call(
        mlp_head_kernel,
        out_shape=jax.ShapeDtypeStruct((B_pad, n_pad), jnp.float32),
        grid=grid,
        in_specs=[
            pl.BlockSpec((TB, 768), lambda i: (i, 0)),   # x tile (f32)
            resident(w1b.shape),                         # w1  [768, 512] bf16
            resident(b1f.shape),                         # b1  [1, 512]   f32
            resident(w2b.shape),                         # w2  [512, 256] bf16
            resident(b2f.shape),                         # b2  [1, 256]   f32
            resident(w3p.shape),                         # w3  [256, n_pad] bf16
            resident(b3p.shape),                         # b3  [1, n_pad] f32
        ],
        out_specs=pl.BlockSpec((TB, n_pad), lambda i: (i, 0)),
        compiler_params=pltpu.CompilerParams(
            dimension_semantics=("parallel",),
            vmem_limit_bytes=40 * 1024 * 1024),
        cost_estimate=pl.CostEstimate(
            flops=flops, transcendentals=0, bytes_accessed=bytes_accessed),
    )(x, w1b, b1f, w2b, b2f, w3p, b3p)

    return out_padded[:B, :num_labels]


def init_params(key, num_labels):
    """Deterministic nn.Linear-style init (uniform(-1/sqrt(fan_in), +))."""
    def linear(k, fan_in, fan_out):
        kw, kb = jax.random.split(k)
        bound = 1.0 / jnp.sqrt(fan_in)
        w = jax.random.uniform(kw, (fan_in, fan_out), jnp.float32,
                               -bound, bound)
        b = jax.random.uniform(kb, (1, fan_out), jnp.float32, -bound, bound)
        return w, b

    k_emb, k1, k2, k3 = jax.random.split(key, 4)
    vocab = 100
    embed_table = jax.random.normal(k_emb, (vocab, 768), jnp.float32) * 0.02
    w1, b1 = linear(k1, 768, 512)
    w2, b2 = linear(k2, 512, 256)
    w3, b3 = linear(k3, 256, num_labels)
    return embed_table, (w1, b1, w2, b2, w3, b3)


def bert_arch_forward(input_ids, attention_mask, embed_table, prepared_params,
                      num_labels):
    # Stand-in for bert(input_ids, attention_mask=attention_mask)[0][:, 0]:
    # CLS embedding = embedding lookup of position-0 token (glue, plain JAX).
    del attention_mask  # consumed by the (external) BERT encoder only
    cls_emb = embed_table[input_ids[:, 0]]          # [B, 768] f32
    w1b, b1f, w2b, b2f, w3p, b3p = prepared_params
    return bert_arch_head(cls_emb, w1b, b1f, w2b, b2f, w3p, b3p,
                          num_labels=num_labels)


if __name__ == "__main__":
    key = jax.random.PRNGKey(0)
    k_params, k_ids = jax.random.split(key)

    num_labels = 3
    batch, seq = 2, 8

    embed_table, raw_params = init_params(k_params, num_labels)
    prepared_params = prepare_head_params(*raw_params)   # once, outside jit

    input_ids = jax.random.randint(k_ids, (batch, seq), 0, 100, jnp.int32)
    attention_mask = jnp.ones((batch, seq), jnp.int32)

    logits = bert_arch_forward(input_ids, attention_mask, embed_table,
                               prepared_params, num_labels)
    jax.block_until_ready(logits)

    # Pure-JAX reference of the fused head (mirrors the in-kernel bf16 matmul
    # operands with f32 accumulation).
    w1b, b1f, w2b, b2f, w3p, b3p = prepared_params
    cls = embed_table[input_ids[:, 0]]
    h = jnp.maximum(jnp.dot(cls.astype(jnp.bfloat16), w1b,
                            preferred_element_type=jnp.float32) + b1f, 0.0)
    h = jnp.maximum(jnp.dot(h.astype(jnp.bfloat16), w2b,
                            preferred_element_type=jnp.float32) + b2f, 0.0)
    ref = (jnp.dot(h.astype(jnp.bfloat16), w3p,
                   preferred_element_type=jnp.float32) + b3p)[:, :num_labels]

    assert logits.shape == (batch, num_labels)
    assert jnp.allclose(logits, ref, atol=5e-3, rtol=5e-3), (
        jnp.max(jnp.abs(logits - ref)))

    print("KERNEL_OK")
</pallas_src>

<mosaic_0001>
module attributes {stable_mosaic.version = 11 : i64} {
  func.func @mlp_head_kernel(%arg0: i32, %arg1: memref<8x768xf32, #tpu.memory_space<vmem>>, %arg2: memref<768x512xbf16, #tpu.memory_space<vmem>>, %arg3: memref<1x512xf32, #tpu.memory_space<vmem>>, %arg4: memref<512x256xbf16, #tpu.memory_space<vmem>>, %arg5: memref<1x256xf32, #tpu.memory_space<vmem>>, %arg6: memref<256x128xbf16, #tpu.memory_space<vmem>>, %arg7: memref<1x128xf32, #tpu.memory_space<vmem>>, %arg8: memref<8x128xf32, #tpu.memory_space<vmem>>) attributes {dimension_semantics = [#tpu.dimension_semantics<parallel>], iteration_bounds = array<i64: 1>, scalar_prefetch = 0 : i64, scratch_operands = 0 : i64, tpu.core_type = #tpu.core_type<tc>, window_params = [{transform_indices = @transform_0, window_bounds = array<i64: 8, 768>}, {pipeline_mode = #tpu.pipeline_mode<synchronous>, transform_indices = @transform_1, window_bounds = array<i64: 768, 512>}, {pipeline_mode = #tpu.pipeline_mode<synchronous>, transform_indices = @transform_2, window_bounds = array<i64: 1, 512>}, {pipeline_mode = #tpu.pipeline_mode<synchronous>, transform_indices = @transform_3, window_bounds = array<i64: 512, 256>}, {pipeline_mode = #tpu.pipeline_mode<synchronous>, transform_indices = @transform_4, window_bounds = array<i64: 1, 256>}, {pipeline_mode = #tpu.pipeline_mode<synchronous>, transform_indices = @transform_5, window_bounds = array<i64: 256, 128>}, {pipeline_mode = #tpu.pipeline_mode<synchronous>, transform_indices = @transform_6, window_bounds = array<i64: 1, 128>}, {transform_indices = @transform_7, window_bounds = array<i64: 8, 128>}]} {
    %c0 = arith.constant 0 : index
    %c0_0 = arith.constant 0 : index
    %0 = vector.load %arg1[%c0, %c0_0] : memref<8x768xf32, #tpu.memory_space<vmem>>, vector<8x768xf32>
    %1 = arith.truncf %0 : vector<8x768xf32> to vector<8x768xbf16>
    %c0_1 = arith.constant 0 : index
    %c0_2 = arith.constant 0 : index
    %2 = vector.load %arg2[%c0_1, %c0_2] : memref<768x512xbf16, #tpu.memory_space<vmem>>, vector<768x512xbf16>
    %cst = arith.constant dense<0.000000e+00> : vector<8x512xf32>
    %3 = tpu.matmul %1, %2, %cst {dimension_numbers = #tpu.dot_dimension_numbers<[1], [0], [0], [1], [0, 0, 1, 1], [], []>} : vector<8x768xbf16>, vector<768x512xbf16>, vector<8x512xf32> -> vector<8x512xf32>
    %c0_3 = arith.constant 0 : index
    %c0_4 = arith.constant 0 : index
    %4 = vector.load %arg3[%c0_3, %c0_4] : memref<1x512xf32, #tpu.memory_space<vmem>>, vector<1x512xf32>
    %5 = vector.broadcast %4 : vector<1x512xf32> to vector<8x512xf32>
    %6 = arith.addf %3, %5 : vector<8x512xf32>
    %cst_5 = arith.constant 0.000000e+00 : f32
    %7 = vector.broadcast %cst_5 : f32 to vector<8x512xf32>
    %8 = arith.maximumf %6, %7 : vector<8x512xf32>
    %9 = arith.truncf %8 : vector<8x512xf32> to vector<8x512xbf16>
    %c0_6 = arith.constant 0 : index
    %c0_7 = arith.constant 0 : index
    %10 = vector.load %arg4[%c0_6, %c0_7] : memref<512x256xbf16, #tpu.memory_space<vmem>>, vector<512x256xbf16>
    %cst_8 = arith.constant dense<0.000000e+00> : vector<8x256xf32>
    %11 = tpu.matmul %9, %10, %cst_8 {dimension_numbers = #tpu.dot_dimension_numbers<[1], [0], [0], [1], [0, 0, 1, 1], [], []>} : vector<8x512xbf16>, vector<512x256xbf16>, vector<8x256xf32> -> vector<8x256xf32>
    %c0_9 = arith.constant 0 : index
    %c0_10 = arith.constant 0 : index
    %12 = vector.load %arg5[%c0_9, %c0_10] : memref<1x256xf32, #tpu.memory_space<vmem>>, vector<1x256xf32>
    %13 = vector.broadcast %12 : vector<1x256xf32> to vector<8x256xf32>
    %14 = arith.addf %11, %13 : vector<8x256xf32>
    %cst_11 = arith.constant 0.000000e+00 : f32
    %15 = vector.broadcast %cst_11 : f32 to vector<8x256xf32>
    %16 = arith.maximumf %14, %15 : vector<8x256xf32>
    %17 = arith.truncf %16 : vector<8x256xf32> to vector<8x256xbf16>
    %c0_12 = arith.constant 0 : index
    %c0_13 = arith.constant 0 : index
    %18 = vector.load %arg6[%c0_12, %c0_13] : memref<256x128xbf16, #tpu.memory_space<vmem>>, vector<256x128xbf16>
    %cst_14 = arith.constant dense<0.000000e+00> : vector<8x128xf32>
    %19 = tpu.matmul %17, %18, %cst_14 {dimension_numbers = #tpu.dot_dimension_numbers<[1], [0], [0], [1], [0, 0, 1, 1], [], []>} : vector<8x256xbf16>, vector<256x128xbf16>, vector<8x128xf32> -> vector<8x128xf32>
    %c0_15 = arith.constant 0 : index
    %c0_16 = arith.constant 0 : index
    %20 = vector.load %arg7[%c0_15, %c0_16] : memref<1x128xf32, #tpu.memory_space<vmem>>, vector<1x128xf32>
    %21 = vector.broadcast %20 : vector<1x128xf32> to vector<8x128xf32>
    %22 = arith.addf %19, %21 : vector<8x128xf32>
    %c0_17 = arith.constant 0 : index
    %c0_18 = arith.constant 0 : index
    %23 = vector.load %arg8[%c0_17, %c0_18] : memref<8x128xf32, #tpu.memory_space<vmem>>, vector<8x128xf32>
    tpu.vector_store %arg8[%c0_17, %c0_18], %22 {strides = array<i32>} : memref<8x128xf32, #tpu.memory_space<vmem>>, vector<8x128xf32>,
    return
  }
  func.func @transform_0(%arg0: i32) -> (i32, i32) {
    %c0_i32 = arith.constant 0 : i32
    %c0_i32_0 = arith.constant 0 : i32
    return %arg0, %c0_i32 : i32, i32
  }
  func.func @transform_1(%arg0: i32) -> (i32, i32) {
    %c0_i32 = arith.constant 0 : i32
    %c0_i32_0 = arith.constant 0 : i32
    %c0_i32_1 = arith.constant 0 : i32
    return %c0_i32, %c0_i32_0 : i32, i32
  }
  func.func @transform_2(%arg0: i32) -> (i32, i32) {
    %c0_i32 = arith.constant 0 : i32
    %c0_i32_0 = arith.constant 0 : i32
    %c0_i32_1 = arith.constant 0 : i32
    return %c0_i32, %c0_i32_0 : i32, i32
  }
  func.func @transform_3(%arg0: i32) -> (i32, i32) {
    %c0_i32 = arith.constant 0 : i32
    %c0_i32_0 = arith.constant 0 : i32
    %c0_i32_1 = arith.constant 0 : i32
    return %c0_i32, %c0_i32_0 : i32, i32
  }
  func.func @transform_4(%arg0: i32) -> (i32, i32) {
    %c0_i32 = arith.constant 0 : i32
    %c0_i32_0 = arith.constant 0 : i32
    %c0_i32_1 = arith.constant 0 : i32
    return %c0_i32, %c0_i32_0 : i32, i32
  }
  func.func @transform_5(%arg0: i32) -> (i32, i32) {
    %c0_i32 = arith.constant 0 : i32
    %c0_i32_0 = arith.constant 0 : i32
    %c0_i32_1 = arith.constant 0 : i32
    return %c0_i32, %c0_i32_0 : i32, i32
  }
  func.func @transform_6(%arg0: i32) -> (i32, i32) {
    %c0_i32 = arith.constant 0 : i32
    %c0_i32_0 = arith.constant 0 : i32
    %c0_i32_1 = arith.constant 0 : i32
    return %c0_i32, %c0_i32_0 : i32, i32
  }
  func.func @transform_7(%arg0: i32) -> (i32, i32) {
    %c0_i32 = arith.constant 0 : i32
    %c0_i32_0 = arith.constant 0 : i32
    return %arg0, %c0_i32 : i32, i32
  }
}

</mosaic_0001>

<bundles_post_ra>
// kernel: bert_arch_head.1
= control target key start
LH: loop header
LB: loop body
LE: loop exit
PB: predicated region body
PF: predicated region fallthrough
CT: control target
= control target key end

     0   :  { %12 = vsyncpa [#allocation3], 0  ;;  %s3129_s0 = inlined_call_operand.vmem [shape: f32[8,768], index: 0, kind: input, shape index: {}]   ;;  %s3130_s1 = inlined_call_operand.hbm [shape: bf16[768,512], index: 1, kind: input, shape index: {}]   ;;  %s3131_s2 = inlined_call_operand.vmem [shape: f32[1,512], index: 2, kind: input, shape index: {}]   ;;  %s3132_s3 = inlined_call_operand.hbm [shape: bf16[512,256], index: 3, kind: input, shape index: {}]   ;;  %s3133_s4 = inlined_call_operand.vmem [shape: f32[1,256], index: 4, kind: input, shape index: {}]   ;;  %s3134_s5 = inlined_call_operand.hbm [shape: bf16[256,128], index: 5, kind: input, shape index: {}]   ;;  %s3135_s6 = inlined_call_operand.vmem [shape: f32[1,128], index: 6, kind: input, shape index: {}]   ;;  %s3136_s7 = inlined_call_operand.vmem [shape: f32[8,128], index: 7, kind: output, shape index: {}]  }
   0x1   :  { %13 = vsyncpa [#allocation5], 0  ;;  %s2970_s24 = smov [#allocation4]   ;;  %s2900_s28 = scalar_lea.hbm %s3132_s3, 8192 }
   0x2   :  { %s35_s25 = sshll.u32 %s2970_s24, 4  ;;  %p2901_p0 = scmp.ne.s32.totalorder %s3132_s3, %s2900_s28  ;;  %s36_s25 = int_to_ptr.vmem [resolvable:$true] %s35_s25 }
   0x3   :  { %p2904_p1 = scmp.lt.u32.totalorder %s2900_s28, %s3132_s3 }
   0x5   :  { %p2906_p2 = pnand %p2904_p1, %p2901_p0 }
   0x7   :  { %2909 = shalt.err (!%p2906_p2)
}
   0x8   :  { %s2910_s10 = scalar_lea.vmem %s36_s25, 8192  ;;  %p2915_p4 = scmp.lt.s32.totalorder %s36_s25, %s36_s25 }
   0x9   :  { %p2911_p3 = scmp.ne.s32.totalorder %s36_s25, %s2910_s10  ;;  %p2916_p5 = scmp.lt.s32.totalorder %s2910_s10, %s2910_s10 }
   0xb   :  { %p2917_p6 = por %p2916_p5, %p2915_p4 }
   0xd   :  { %p2918_p7 = pnand %p2917_p6, %p2911_p3 }
   0xf   :  { %2921 = shalt.err (!%p2918_p7)
}
  0x10   :  { %s2971_s11 = smov 128   ;;  %s2972_s12 = smov 8  }
  0x11   :  { %41 = dma.hbm_to_vmem [thread:$0]  %s3132_s3, 8192, %s36_s25, [#allocation5], %s2971_s11, %s2971_s11, %s2972_s12  }
  0x12   :  { %s2973_s15 = smov [#allocation2]   ;;  %s2922_s19 = scalar_lea.hbm %s3130_s1, 24576 }
  0x13   :  { %s21_s16 = sshll.u32 %s2973_s15, 4  ;;  %p2923_p8 = scmp.ne.s32.totalorder %s3130_s1, %s2922_s19  ;;  %s22_s16 = int_to_ptr.vmem [resolvable:$true] %s21_s16 }
  0x14   :  { %p2926_p9 = scmp.lt.u32.totalorder %s2922_s19, %s3130_s1 }
  0x16   :  { %p2928_p10 = pnand %p2926_p9, %p2923_p8 }
  0x18   :  { %2931 = shalt.err (!%p2928_p10)
}
  0x19   :  { %s2932_s24 = scalar_lea.vmem %s22_s16, 24576  ;;  %p2937_p12 = scmp.lt.s32.totalorder %s22_s16, %s22_s16 }
  0x1a   :  { %p2933_p11 = scmp.ne.s32.totalorder %s22_s16, %s2932_s24  ;;  %p2938_p13 = scmp.lt.s32.totalorder %s2932_s24, %s2932_s24 }
  0x1c   :  { %p2939_p0 = por %p2938_p13, %p2937_p12 }
  0x1e   :  { %p2940_p1 = pnand %p2939_p0, %p2933_p11 }
  0x20   :  { %2943 = shalt.err (!%p2940_p1)
}
  0x21   :  { %s2974_s3 = smov 256   ;;  %s2975_s25 = smov 16  }
  0x22   :  { %27 = dma.hbm_to_vmem [thread:$0]  %s3130_s1, 24576, %s22_s16, [#allocation3], %s2974_s3, %s2974_s3, %s2975_s25  }
  0x23   :  { %s2976_s28 = smov [#allocation6]   ;;  %s2944_s9 = scalar_lea.hbm %s3134_s5, 2048 }
  0x24   :  { %s49_s29 = sshll.u32 %s2976_s28, 4  ;;  %p2945_p2 = scmp.ne.s32.totalorder %s3134_s5, %s2944_s9  ;;  %s50_s29 = int_to_ptr.vmem [resolvable:$true] %s49_s29 }
  0x25   :  { %p2948_p3 = scmp.lt.u32.totalorder %s2944_s9, %s3134_s5 }
  0x27   :  { %p2950_p4 = pnand %p2948_p3, %p2945_p2 }
  0x29   :  { %2953 = shalt.err (!%p2950_p4)
}
  0x2a   :  { %s2954_s14 = scalar_lea.vmem %s50_s29, 2048  ;;  %p2959_p6 = scmp.lt.s32.totalorder %s50_s29, %s50_s29 }
  0x2b   :  { %p2955_p5 = scmp.ne.s32.totalorder %s50_s29, %s2954_s14  ;;  %p2960_p7 = scmp.lt.s32.totalorder %s2954_s14, %s2954_s14 }
  0x2d   :  { %p2961_p8 = por %p2960_p7, %p2959_p6 }
  0x2f   :  { %p2962_p9 = pnand %p2961_p8, %p2955_p5 }
  0x31   :  { %2965 = shalt.err (!%p2962_p9)
}
  0x32   :  { %s2977_s1 = smov 64   ;;  %s2978_s15 = smov 4  }
  0x33   :  { %55 = dma.hbm_to_vmem [thread:$0]  %s3134_s5, 2048, %s50_s29, [#allocation5], %s2977_s1, %s2977_s1, %s2978_s15  }
  0x34   :  { %2966 = dma.done.wait [#allocation3], 24576  }
  0x35   :  { %2967 = vsyncadd [#allocation3], 4294942720 }
  0x36   :  { %2968 = dma.done.wait [#allocation5], 10240  }
  0x37   :  { %2969 = vsyncadd [#allocation5], 4294957056  ;;  %v2500_v0 = vld [vmem:[#allocation2 + $0x4] ss:$16 sps:$4 sm:$0xff]   ;;  %v2504_v2 = vld [vmem:[#allocation2] ss:$16 sps:$4 sm:$0xff]  }
  0x38   :  { %v2502_v1 = vld [vmem:[#allocation2 + $0x204] ss:$16 sps:$4 sm:$0xff]   ;;  %1254 = vmatprep.subr.bf16.mxu1 %v2500_v0  ;;  %v2505_v3 = vld [vmem:[#allocation2 + $0x200] ss:$16 sps:$4 sm:$0xff]   ;;  %v69_v46 = vld [vmem:[%s3129_s0 + $0x8] sm:$0xff] }
  0x39   :  { %1295 = vmatprep.subr.bf16.mxu0 %v2502_v1  ;;  %v2506_v4 = vld [vmem:[#allocation2 + $0x24] ss:$16 sps:$4 sm:$0xff]   ;;  %1255 = vmatpush1.bf16.msra.mxu1 %v2504_v2  ;;  %v2510_v6 = vld [vmem:[#allocation2 + $0x20] ss:$16 sps:$4 sm:$0xff]   ;;  %v3058_v48 = vpack.c.bf16 %v69_v46, %v69_v46  ;;  %v71_v49 = vld [vmem:[%s3129_s0 + $0x18] sm:$0xff] }
  0x3a   :  { %1296 = vmatpush1.bf16.msra.mxu0 %v2505_v3  ;;  %v2508_v5 = vld [vmem:[#allocation2 + $0x224] ss:$16 sps:$4 sm:$0xff]   ;;  %1256 = vmatprep.subr.bf16.mxu1 %v2506_v4  ;;  %v2511_v7 = vld [vmem:[#allocation2 + $0x220] ss:$16 sps:$4 sm:$0xff]   ;;  %v3063_v52 = vpack.c.bf16 %v71_v49, %v71_v49  ;;  %v2653_v49 = vld [vmem:[#allocation2 + $0x128] ss:$16 sps:$4 sm:$0xff]  }
  0x3b   :  { %1297 = vmatprep.subr.bf16.mxu0 %v2508_v5  ;;  %v2512_v8 = vld [vmem:[#allocation2 + $0x44] ss:$16 sps:$4 sm:$0xff]   ;;  %v2516_v10 = vld [vmem:[#allocation2 + $0x40] ss:$16 sps:$4 sm:$0xff]   ;;  %1286 = vmatprep.mubr.bf16.mxu1 %v3058_v48 }
  0x3c   :  { %v2514_v9 = vld [vmem:[#allocation2 + $0x244] ss:$16 sps:$4 sm:$0xff]   ;;  %v2517_v11 = vld [vmem:[#allocation2 + $0x240] ss:$16 sps:$4 sm:$0xff]   ;;  %1327 = vmatprep.mubr.bf16.mxu0 %v3063_v52 }
  0x3d   :  { %1257 = vmatpush1.bf16.msra.mxu1 %v2510_v6  ;;  %v2518_v12 = vld [vmem:[#allocation2 + $0x64] ss:$16 sps:$4 sm:$0xff]   ;;  %v2522_v14 = vld [vmem:[#allocation2 + $0x60] ss:$16 sps:$4 sm:$0xff]  }
  0x3e   :  { %1298 = vmatpush1.bf16.msra.mxu0 %v2511_v7  ;;  %1258 = vmatprep.subr.bf16.mxu1 %v2512_v8  ;;  %v2520_v13 = vld [vmem:[#allocation2 + $0x264] ss:$16 sps:$4 sm:$0xff]   ;;  %v2523_v15 = vld [vmem:[#allocation2 + $0x260] ss:$16 sps:$4 sm:$0xff]   ;;  %v2601_v7 = vld [vmem:[#allocation2 + $0xc] ss:$16 sps:$4 sm:$0xff]  }
  0x3f   :  { %1299 = vmatprep.subr.bf16.mxu0 %v2514_v9  ;;  %v2524_v16 = vld [vmem:[#allocation2 + $0x84] ss:$16 sps:$4 sm:$0xff]   ;;  %v2528_v18 = vld [vmem:[#allocation2 + $0x80] ss:$16 sps:$4 sm:$0xff]  }
  0x40   :  { %v2526_v17 = vld [vmem:[#allocation2 + $0x284] ss:$16 sps:$4 sm:$0xff]   ;;  %v2529_v19 = vld [vmem:[#allocation2 + $0x280] ss:$16 sps:$4 sm:$0xff]  }
  0x41   :  { %1259 = vmatpush1.bf16.msra.mxu1 %v2516_v10  ;;  %v2530_v20 = vld [vmem:[#allocation2 + $0xa4] ss:$16 sps:$4 sm:$0xff]   ;;  %v2534_v22 = vld [vmem:[#allocation2 + $0xa0] ss:$16 sps:$4 sm:$0xff]   ;;  %v2599_v10 = vld [vmem:[#allocation2 + $0x8] ss:$16 sps:$4 sm:$0xff]  }
  0x42   :  { %1300 = vmatpush1.bf16.msra.mxu0 %v2517_v11  ;;  %1260 = vmatprep.subr.bf16.mxu1 %v2518_v12  ;;  %v2532_v21 = vld [vmem:[#allocation2 + $0x2a4] ss:$16 sps:$4 sm:$0xff]   ;;  %v2535_v23 = vld [vmem:[#allocation2 + $0x2a0] ss:$16 sps:$4 sm:$0xff]  }
  0x43   :  { %1301 = vmatprep.subr.bf16.mxu0 %v2520_v13  ;;  %v2536_v24 = vld [vmem:[#allocation2 + $0xc4] ss:$16 sps:$4 sm:$0xff]   ;;  %v2540_v26 = vld [vmem:[#allocation2 + $0xc0] ss:$16 sps:$4 sm:$0xff]   ;;  %v2607_v13 = vld [vmem:[#allocation2 + $0x2c] ss:$16 sps:$4 sm:$0xff]  }
  0x44   :  { %v2538_v25 = vld [vmem:[#allocation2 + $0x2c4] ss:$16 sps:$4 sm:$0xff]   ;;  %v2541_v27 = vld [vmem:[#allocation2 + $0x2c0] ss:$16 sps:$4 sm:$0xff]  }
  0x45   :  { %1261 = vmatpush1.bf16.msra.mxu1 %v2522_v14  ;;  %v2542_v28 = vld [vmem:[#allocation2 + $0xe4] ss:$16 sps:$4 sm:$0xff]   ;;  %v2546_v30 = vld [vmem:[#allocation2 + $0xe0] ss:$16 sps:$4 sm:$0xff]  }
  0x46   :  { %1302 = vmatpush1.bf16.msra.mxu0 %v2523_v15  ;;  %1262 = vmatprep.subr.bf16.mxu1 %v2524_v16  ;;  %v2544_v29 = vld [vmem:[#allocation2 + $0x2e4] ss:$16 sps:$4 sm:$0xff]   ;;  %v2547_v31 = vld [vmem:[#allocation2 + $0x2e0] ss:$16 sps:$4 sm:$0xff]   ;;  %v2605_v15 = vld [vmem:[#allocation2 + $0x28] ss:$16 sps:$4 sm:$0xff]  }
  0x47   :  { %1303 = vmatprep.subr.bf16.mxu0 %v2526_v17  ;;  %v2548_v32 = vld [vmem:[#allocation2 + $0x104] ss:$16 sps:$4 sm:$0xff]   ;;  %v2552_v34 = vld [vmem:[#allocation2 + $0x100] ss:$16 sps:$4 sm:$0xff]   ;;  %v2613_v17 = vld [vmem:[#allocation2 + $0x4c] ss:$16 sps:$4 sm:$0xff]  }
  0x48   :  { %v2550_v33 = vld [vmem:[#allocation2 + $0x304] ss:$16 sps:$4 sm:$0xff]   ;;  %v2553_v35 = vld [vmem:[#allocation2 + $0x300] ss:$16 sps:$4 sm:$0xff]  }
  0x49   :  { %1263 = vmatpush1.bf16.msra.mxu1 %v2528_v18  ;;  %v2554_v36 = vld [vmem:[#allocation2 + $0x124] ss:$16 sps:$4 sm:$0xff]   ;;  %v2558_v38 = vld [vmem:[#allocation2 + $0x120] ss:$16 sps:$4 sm:$0xff]  }
  0x4a   :  { %1304 = vmatpush1.bf16.msra.mxu0 %v2529_v19  ;;  %1264 = vmatprep.subr.bf16.mxu1 %v2530_v20  ;;  %v2556_v37 = vld [vmem:[#allocation2 + $0x324] ss:$16 sps:$4 sm:$0xff]   ;;  %v2559_v39 = vld [vmem:[#allocation2 + $0x320] ss:$16 sps:$4 sm:$0xff]   ;;  %v2611_v19 = vld [vmem:[#allocation2 + $0x48] ss:$16 sps:$4 sm:$0xff]  }
  0x4b   :  { %1305 = vmatprep.subr.bf16.mxu0 %v2532_v21  ;;  %v2560_v40 = vld [vmem:[#allocation2 + $0x144] ss:$16 sps:$4 sm:$0xff]   ;;  %v2564_v42 = vld [vmem:[#allocation2 + $0x140] ss:$16 sps:$4 sm:$0xff]   ;;  %v2619_v21 = vld [vmem:[#allocation2 + $0x6c] ss:$16 sps:$4 sm:$0xff]  }
  0x4c   :  { %v2562_v41 = vld [vmem:[#allocation2 + $0x344] ss:$16 sps:$4 sm:$0xff]   ;;  %v2565_v43 = vld [vmem:[#allocation2 + $0x340] ss:$16 sps:$4 sm:$0xff]  }
  0x4d   :  { %1265 = vmatpush1.bf16.msra.mxu1 %v2534_v22  ;;  %v2566_v44 = vld [vmem:[#allocation2 + $0x164] ss:$16 sps:$4 sm:$0xff]   ;;  %v2570_v47 = vld [vmem:[#allocation2 + $0x160] ss:$16 sps:$4 sm:$0xff]  }
  0x4e   :  { %1306 = vmatpush1.bf16.msra.mxu0 %v2535_v23  ;;  %1266 = vmatprep.subr.bf16.mxu1 %v2536_v24  ;;  %v2568_v45 = vld [vmem:[#allocation2 + $0x364] ss:$16 sps:$4 sm:$0xff]   ;;  %v2571_v50 = vld [vmem:[#allocation2 + $0x360] ss:$16 sps:$4 sm:$0xff]   ;;  %v2617_v23 = vld [vmem:[#allocation2 + $0x68] ss:$16 sps:$4 sm:$0xff]  }
  0x4f   :  { %1307 = vmatprep.subr.bf16.mxu0 %v2538_v25  ;;  %v2572_v51 = vld [vmem:[#allocation2 + $0x184] ss:$16 sps:$4 sm:$0xff]   ;;  %v2576_v54 = vld [vmem:[#allocation2 + $0x180] ss:$16 sps:$4 sm:$0xff]   ;;  %v2625_v25 = vld [vmem:[#allocation2 + $0x8c] ss:$16 sps:$4 sm:$0xff]  }
  0x50   :  { %v2574_v53 = vld [vmem:[#allocation2 + $0x384] ss:$16 sps:$4 sm:$0xff]   ;;  %v2577_v55 = vld [vmem:[#allocation2 + $0x380] ss:$16 sps:$4 sm:$0xff]  }
  0x51   :  { %1267 = vmatpush1.bf16.msra.mxu1 %v2540_v26  ;;  %v2578_v56 = vld [vmem:[#allocation2 + $0x1a4] ss:$16 sps:$4 sm:$0xff]   ;;  %v2582_v58 = vld [vmem:[#allocation2 + $0x1a0] ss:$16 sps:$4 sm:$0xff]  }
  0x52   :  { %1308 = vmatpush1.bf16.msra.mxu0 %v2541_v27  ;;  %1268 = vmatprep.subr.bf16.mxu1 %v2542_v28  ;;  %v2580_v57 = vld [vmem:[#allocation2 + $0x3a4] ss:$16 sps:$4 sm:$0xff]   ;;  %v2583_v59 = vld [vmem:[#allocation2 + $0x3a0] ss:$16 sps:$4 sm:$0xff]   ;;  %v2623_v27 = vld [vmem:[#allocation2 + $0x88] ss:$16 sps:$4 sm:$0xff]  }
  0x53   :  { %1309 = vmatprep.subr.bf16.mxu0 %v2544_v29  ;;  %v2584_v60 = vld [vmem:[#allocation2 + $0x1c4] ss:$16 sps:$4 sm:$0xff]   ;;  %v2588_v62 = vld [vmem:[#allocation2 + $0x1c0] ss:$16 sps:$4 sm:$0xff]   ;;  %v2631_v29 = vld [vmem:[#allocation2 + $0xac] ss:$16 sps:$4 sm:$0xff]  }
  0x54   :  { %v2586_v61 = vld [vmem:[#allocation2 + $0x3c4] ss:$16 sps:$4 sm:$0xff]   ;;  %v2589_v63 = vld [vmem:[#allocation2 + $0x3c0] ss:$16 sps:$4 sm:$0xff]  }
  0x55   :  { %1269 = vmatpush1.bf16.msra.mxu1 %v2546_v30  ;;  %v2590_v0 = vld [vmem:[#allocation2 + $0x1e4] ss:$16 sps:$4 sm:$0xff]   ;;  %v2594_v2 = vld [vmem:[#allocation2 + $0x1e0] ss:$16 sps:$4 sm:$0xff]  }
  0x56   :  { %1310 = vmatpush1.bf16.msra.mxu0 %v2547_v31  ;;  %1270 = vmatprep.subr.bf16.mxu1 %v2548_v32  ;;  %v2592_v1 = vld [vmem:[#allocation2 + $0x3e4] ss:$16 sps:$4 sm:$0xff]   ;;  %v2595_v3 = vld [vmem:[#allocation2 + $0x3e0] ss:$16 sps:$4 sm:$0xff]   ;;  %v2629_v31 = vld [vmem:[#allocation2 + $0xa8] ss:$16 sps:$4 sm:$0xff]  }
  0x57   :  { %1311 = vmatprep.subr.bf16.mxu0 %v2550_v33  ;;  %v68_v4 = vld [vmem:[%s3129_s0] sm:$0xff]  ;;  %v70_v6 = vld [vmem:[%s3129_s0 + $0x10] sm:$0xff]  ;;  %v2637_v33 = vld [vmem:[#allocation2 + $0xcc] ss:$16 sps:$4 sm:$0xff]  }
  0x58   :  { %v2598_v5 = vld [vmem:[#allocation2 + $0x404] ss:$16 sps:$4 sm:$0xff]   ;;  %v3073_v8 = vpack.c.bf16 %v68_v4, %v68_v4  ;;  %v2596_v9 = vld [vmem:[#allocation2 + $0x400] ss:$16 sps:$4 sm:$0xff]   ;;  %v3075_v11 = vpack.c.bf16 %v70_v6, %v70_v6  ;;  %v2685_v4 = vld [vmem:[#allocation2 + $0x1cc] ss:$16 sps:$4 sm:$0xff]  }
  0x59   :  { %1271 = vmatpush1.bf16.msra.mxu1 %v2552_v34  ;;  %v2604_v12 = vld [vmem:[#allocation2 + $0x424] ss:$16 sps:$4 sm:$0xff]   ;;  %v2602_v14 = vld [vmem:[#allocation2 + $0x420] ss:$16 sps:$4 sm:$0xff]   ;;  %v73_v34 = vld [vmem:[%s3129_s0 + $0x28] sm:$0xff] }
  0x5a   :  { %1312 = vmatpush1.bf16.msra.mxu0 %v2553_v35  ;;  %1272 = vmatprep.subr.bf16.mxu1 %v2554_v36  ;;  %v2610_v16 = vld [vmem:[#allocation2 + $0x444] ss:$16 sps:$4 sm:$0xff]   ;;  %v2608_v18 = vld [vmem:[#allocation2 + $0x440] ss:$16 sps:$4 sm:$0xff]   ;;  %v3083_v35 = vpack.c.bf16 %v73_v34, %v73_v34  ;;  %v2683_v6 = vld [vmem:[#allocation2 + $0x1c8] ss:$16 sps:$4 sm:$0xff]  }
  0x5b   :  { %1313 = vmatprep.subr.bf16.mxu0 %v2556_v37  ;;  %v2616_v20 = vld [vmem:[#allocation2 + $0x464] ss:$16 sps:$4 sm:$0xff]   ;;  %v2614_v22 = vld [vmem:[#allocation2 + $0x460] ss:$16 sps:$4 sm:$0xff]   ;;  %v2635_v37 = vld [vmem:[#allocation2 + $0xc8] ss:$16 sps:$4 sm:$0xff]  }
  0x5c   :  { %v2622_v24 = vld [vmem:[#allocation2 + $0x484] ss:$16 sps:$4 sm:$0xff]   ;;  %v2620_v26 = vld [vmem:[#allocation2 + $0x480] ss:$16 sps:$4 sm:$0xff]  }
  0x5d   :  { %1273 = vmatpush1.bf16.msra.mxu1 %v2558_v38  ;;  %v2628_v28 = vld [vmem:[#allocation2 + $0x4a4] ss:$16 sps:$4 sm:$0xff]   ;;  %v2626_v30 = vld [vmem:[#allocation2 + $0x4a0] ss:$16 sps:$4 sm:$0xff]  }
  0x5e   :  { %1314 = vmatpush1.bf16.msra.mxu0 %v2559_v39  ;;  %1274 = vmatprep.subr.bf16.mxu1 %v2560_v40  ;;  %v2634_v32 = vld [vmem:[#allocation2 + $0x4c4] ss:$16 sps:$4 sm:$0xff]   ;;  %v2632_v36 = vld [vmem:[#allocation2 + $0x4c0] ss:$16 sps:$4 sm:$0xff]   ;;  %v2643_v39 = vld [vmem:[#allocation2 + $0xec] ss:$16 sps:$4 sm:$0xff]  }
  0x5f   :  { %1315 = vmatprep.subr.bf16.mxu0 %v2562_v41  ;;  %v2640_v38 = vld [vmem:[#allocation2 + $0x4e4] ss:$16 sps:$4 sm:$0xff]   ;;  %v2638_v40 = vld [vmem:[#allocation2 + $0x4e0] ss:$16 sps:$4 sm:$0xff]   ;;  %v2641_v41 = vld [vmem:[#allocation2 + $0xe8] ss:$16 sps:$4 sm:$0xff]  }
  0x60   :  { %v2652_v46 = vld [vmem:[#allocation2 + $0x524] ss:$16 sps:$4 sm:$0xff]  }
  0x61   :  { %1275 = vmatpush1.bf16.msra.mxu1 %v2564_v42  ;;  %v2646_v42 = vld [vmem:[#allocation2 + $0x504] ss:$16 sps:$4 sm:$0xff]  }
  0x62   :  { %1316 = vmatpush1.bf16.msra.mxu0 %v2565_v43  ;;  %1276 = vmatprep.subr.bf16.mxu1 %v2566_v44  ;;  %v2649_v43 = vld [vmem:[#allocation2 + $0x10c] ss:$16 sps:$4 sm:$0xff]   ;;  %v2644_v44 = vld [vmem:[#allocation2 + $0x500] ss:$16 sps:$4 sm:$0xff]  }
  0x63   :  { %1317 = vmatprep.subr.bf16.mxu0 %v2568_v45  ;;  %v2647_v45 = vld [vmem:[#allocation2 + $0x108] ss:$16 sps:$4 sm:$0xff]   ;;  %v2796_v34 = vld [vmem:[#allocation4 + $0x24] ss:$8 sps:$4 sm:$0xff]  }
  0x65   :  { %1277 = vmatpush1.bf16.msra.mxu1 %v2570_v47  ;;  %v2655_v47 = vld [vmem:[#allocation2 + $0x12c] ss:$16 sps:$4 sm:$0xff]  }
  0x66   :  { %1318 = vmatpush1.bf16.msra.mxu0 %v2571_v50  ;;  %1278 = vmatprep.subr.bf16.mxu1 %v2572_v51  ;;  %v2658_v50 = vld [vmem:[#allocation2 + $0x544] ss:$16 sps:$4 sm:$0xff]   ;;  %v2661_v51 = vld [vmem:[#allocation2 + $0x14c] ss:$16 sps:$4 sm:$0xff]  }
  0x67   :  { %1319 = vmatprep.subr.bf16.mxu0 %v2574_v53  ;;  %v2656_v53 = vld [vmem:[#allocation2 + $0x540] ss:$16 sps:$4 sm:$0xff]  }
  0x69   :  { %1279 = vmatpush1.bf16.msra.mxu1 %v2576_v54  ;;  %v2659_v54 = vld [vmem:[#allocation2 + $0x148] ss:$16 sps:$4 sm:$0xff]  }
  0x6a   :  { %1320 = vmatpush1.bf16.msra.mxu0 %v2577_v55  ;;  %1280 = vmatprep.subr.bf16.mxu1 %v2578_v56  ;;  %v2664_v55 = vld [vmem:[#allocation2 + $0x564] ss:$16 sps:$4 sm:$0xff]   ;;  %v2667_v56 = vld [vmem:[#allocation2 + $0x16c] ss:$16 sps:$4 sm:$0xff]  }
  0x6b   :  { %1321 = vmatprep.subr.bf16.mxu0 %v2580_v57  ;;  %v2662_v57 = vld [vmem:[#allocation2 + $0x560] ss:$16 sps:$4 sm:$0xff]  }
  0x6d   :  { %1281 = vmatpush1.bf16.msra.mxu1 %v2582_v58  ;;  %v2665_v58 = vld [vmem:[#allocation2 + $0x168] ss:$16 sps:$4 sm:$0xff]  }
  0x6e   :  { %1322 = vmatpush1.bf16.msra.mxu0 %v2583_v59  ;;  %1282 = vmatprep.subr.bf16.mxu1 %v2584_v60  ;;  %v2670_v59 = vld [vmem:[#allocation2 + $0x584] ss:$16 sps:$4 sm:$0xff]   ;;  %v2673_v60 = vld [vmem:[#allocation2 + $0x18c] ss:$16 sps:$4 sm:$0xff]  }
  0x6f   :  { %1323 = vmatprep.subr.bf16.mxu0 %v2586_v61  ;;  %v2668_v61 = vld [vmem:[#allocation2 + $0x580] ss:$16 sps:$4 sm:$0xff]  }
  0x71   :  { %1283 = vmatpush1.bf16.msra.mxu1 %v2588_v62  ;;  %v2671_v62 = vld [vmem:[#allocation2 + $0x188] ss:$16 sps:$4 sm:$0xff]  }
  0x72   :  { %1324 = vmatpush1.bf16.msra.mxu0 %v2589_v63  ;;  %1284 = vmatprep.subr.bf16.mxu1 %v2590_v0  ;;  %v2676_v63 = vld [vmem:[#allocation2 + $0x5a4] ss:$16 sps:$4 sm:$0xff]   ;;  %v2679_v0 = vld [vmem:[#allocation2 + $0x1ac] ss:$16 sps:$4 sm:$0xff]  }
  0x73   :  { %1325 = vmatprep.subr.bf16.mxu0 %v2592_v1  ;;  %v2674_v1 = vld [vmem:[#allocation2 + $0x5a0] ss:$16 sps:$4 sm:$0xff]  }
  0x75   :  { %1285 = vmatpush1.bf16.msra.mxu1 %v2594_v2  ;;  %v2677_v2 = vld [vmem:[#allocation2 + $0x1a8] ss:$16 sps:$4 sm:$0xff]  }
  0x76   :  { %1326 = vmatpush1.bf16.msra.mxu0 %v2595_v3  ;;  %1377 = vmatprep.subr.bf16.mxu1 %v2601_v7  ;;  %v2682_v3 = vld [vmem:[#allocation2 + $0x5c4] ss:$16 sps:$4 sm:$0xff]  }
  0x77   :  { %1336 = vmatprep.subr.bf16.mxu0 %v2598_v5  ;;  %v2680_v5 = vld [vmem:[#allocation2 + $0x5c0] ss:$16 sps:$4 sm:$0xff]   ;;  %v2688_v7 = vld [vmem:[#allocation2 + $0x5e4] ss:$16 sps:$4 sm:$0xff]  }
  0x78   :  { %1287 = vmatmul.mubr.bf16.vlgmr.msra.gmra.mrb[0].mxu1 %v3073_v8 }
  0x79   :  { %1328 = vmatmul.mubr.bf16.vlgmr.msra.gmra.mrb[0].mxu0 %v3075_v11  ;;  %1378 = vmatpush1.bf16.msra.mxu1 %v2599_v10  ;;  %v2686_v10 = vld [vmem:[#allocation2 + $0x5e0] ss:$16 sps:$4 sm:$0xff]  }
  0x7a   :  { %1337 = vmatpush1.bf16.msra.mxu0 %v2596_v9  ;;  %1379 = vmatprep.subr.bf16.mxu1 %v2607_v13  ;;  %v2691_v9 = vld [vmem:[#allocation2 + $0x1ec] ss:$16 sps:$4 sm:$0xff]   ;;  %v72_v13 = vld [vmem:[%s3129_s0 + $0x20] sm:$0xff] }
  0x7b   :  { %1338 = vmatprep.subr.bf16.mxu0 %v2604_v12  ;;  %1409 = vmatprep.mubr.bf16.mxu1 %v3058_v48  ;;  %v2650_v48 = vld [vmem:[#allocation2 + $0x520] ss:$16 sps:$4 sm:$0xff]   ;;  %v2689_v12 = vld [vmem:[#allocation2 + $0x1e8] ss:$16 sps:$4 sm:$0xff]  }
  0x7c   :  { %1368 = vmatprep.mubr.bf16.mxu0 %v3083_v35 }
  0x7d   :  { %1380 = vmatpush1.bf16.msra.mxu1 %v2605_v15  ;;  %v3089_v15 = vpack.c.bf16 %v72_v13, %v72_v13  ;;  %v2821_v13 = vld [vmem:[#allocation4 + $0xb0] ss:$8 sps:$4 sm:$0xff]  }
  0x7e   :  { %1339 = vmatpush1.bf16.msra.mxu0 %v2602_v14  ;;  %1381 = vmatprep.subr.bf16.mxu1 %v2613_v17  ;;  %v2694_v14 = vld [vmem:[#allocation2 + $0x20c] ss:$16 sps:$4 sm:$0xff]  }
  0x7f   :  { %1340 = vmatprep.subr.bf16.mxu0 %v2610_v16  ;;  %v2692_v16 = vld [vmem:[#allocation2 + $0x208] ss:$16 sps:$4 sm:$0xff]   ;;  %v2697_v17 = vld [vmem:[#allocation2 + $0x22c] ss:$16 sps:$4 sm:$0xff]  }
  0x81   :  { %1382 = vmatpush1.bf16.msra.mxu1 %v2611_v19  ;;  %v2700_v19 = vld [vmem:[#allocation2 + $0x24c] ss:$16 sps:$4 sm:$0xff]  }
  0x82   :  { %1341 = vmatpush1.bf16.msra.mxu0 %v2608_v18  ;;  %1383 = vmatprep.subr.bf16.mxu1 %v2619_v21  ;;  %v2695_v18 = vld [vmem:[#allocation2 + $0x228] ss:$16 sps:$4 sm:$0xff]   ;;  %v2703_v21 = vld [vmem:[#allocation2 + $0x26c] ss:$16 sps:$4 sm:$0xff]  }
  0x83   :  { %1342 = vmatprep.subr.bf16.mxu0 %v2616_v20  ;;  %v2698_v20 = vld [vmem:[#allocation2 + $0x248] ss:$16 sps:$4 sm:$0xff]  }
  0x85   :  { %1384 = vmatpush1.bf16.msra.mxu1 %v2617_v23  ;;  %v2706_v23 = vld [vmem:[#allocation2 + $0x28c] ss:$16 sps:$4 sm:$0xff]  }
  0x86   :  { %1343 = vmatpush1.bf16.msra.mxu0 %v2614_v22  ;;  %1385 = vmatprep.subr.bf16.mxu1 %v2625_v25  ;;  %v2701_v22 = vld [vmem:[#allocation2 + $0x268] ss:$16 sps:$4 sm:$0xff]   ;;  %v2709_v25 = vld [vmem:[#allocation2 + $0x2ac] ss:$16 sps:$4 sm:$0xff]  }
  0x87   :  { %1344 = vmatprep.subr.bf16.mxu0 %v2622_v24  ;;  %v2704_v24 = vld [vmem:[#allocation2 + $0x288] ss:$16 sps:$4 sm:$0xff]  }
  0x89   :  { %1386 = vmatpush1.bf16.msra.mxu1 %v2623_v27  ;;  %v2712_v27 = vld [vmem:[#allocation2 + $0x2cc] ss:$16 sps:$4 sm:$0xff]  }
  0x8a   :  { %1345 = vmatpush1.bf16.msra.mxu0 %v2620_v26  ;;  %1387 = vmatprep.subr.bf16.mxu1 %v2631_v29  ;;  %v2707_v26 = vld [vmem:[#allocation2 + $0x2a8] ss:$16 sps:$4 sm:$0xff]   ;;  %v2790_v29 = vld [vmem:[#allocation4 + $0x4] ss:$8 sps:$4 sm:$0xff]  }
  0x8b   :  { %1346 = vmatprep.subr.bf16.mxu0 %v2628_v28  ;;  %v2788_v28 = vld [vmem:[#allocation4] ss:$8 sps:$4 sm:$0xff]  }
  0x8d   :  { %1388 = vmatpush1.bf16.msra.mxu1 %v2629_v31  ;;  %v2713_v31 = vld [vmem:[#allocation2 + $0x2e8] ss:$16 sps:$4 sm:$0xff]  }
  0x8e   :  { %1347 = vmatpush1.bf16.msra.mxu0 %v2626_v30  ;;  %1389 = vmatprep.subr.bf16.mxu1 %v2637_v33  ;;  %v2793_v30 = vld [vmem:[#allocation4 + $0x14] ss:$8 sps:$4 sm:$0xff]  }
  0x8f   :  { %1348 = vmatprep.subr.bf16.mxu0 %v2634_v32  ;;  %v2791_v32 = vld [vmem:[#allocation4 + $0x10] ss:$8 sps:$4 sm:$0xff]   ;;  %v2718_v33 = vld [vmem:[#allocation2 + $0x30c] ss:$16 sps:$4 sm:$0xff]  }
  0x91   :  { %1390 = vmatpush1.bf16.msra.mxu1 %v2635_v37  ;;  %v2794_v37 = vld [vmem:[#allocation4 + $0x20] ss:$8 sps:$4 sm:$0xff]  }
  0x92   :  { %1349 = vmatpush1.bf16.msra.mxu0 %v2632_v36  ;;  %1391 = vmatprep.subr.bf16.mxu1 %v2643_v39  ;;  %v2716_v36 = vld [vmem:[#allocation2 + $0x308] ss:$16 sps:$4 sm:$0xff]   ;;  %v2799_v39 = vld [vmem:[#allocation4 + $0x34] ss:$8 sps:$4 sm:$0xff]  }
  0x93   :  { %1350 = vmatprep.subr.bf16.mxu0 %v2640_v38  ;;  %v2721_v38 = vld [vmem:[#allocation2 + $0x32c] ss:$16 sps:$4 sm:$0xff]  }
  0x95   :  { %1392 = vmatpush1.bf16.msra.mxu1 %v2641_v41  ;;  %v2797_v41 = vld [vmem:[#allocation4 + $0x30] ss:$8 sps:$4 sm:$0xff]  }
  0x96   :  { %1351 = vmatpush1.bf16.msra.mxu0 %v2638_v40  ;;  %1393 = vmatprep.subr.bf16.mxu1 %v2649_v43  ;;  %v2719_v40 = vld [vmem:[#allocation2 + $0x328] ss:$16 sps:$4 sm:$0xff]   ;;  %v2802_v43 = vld [vmem:[#allocation4 + $0x44] ss:$8 sps:$4 sm:$0xff]  }
  0x97   :  { %1352 = vmatprep.subr.bf16.mxu0 %v2646_v42  ;;  %v2724_v42 = vld [vmem:[#allocation2 + $0x34c] ss:$16 sps:$4 sm:$0xff]  }
  0x99   :  { %1394 = vmatpush1.bf16.msra.mxu1 %v2647_v45  ;;  %v2800_v45 = vld [vmem:[#allocation4 + $0x40] ss:$8 sps:$4 sm:$0xff]  }
  0x9a   :  { %1353 = vmatpush1.bf16.msra.mxu0 %v2644_v44  ;;  %1395 = vmatprep.subr.bf16.mxu1 %v2655_v47  ;;  %v2722_v44 = vld [vmem:[#allocation2 + $0x348] ss:$16 sps:$4 sm:$0xff]   ;;  %v2805_v47 = vld [vmem:[#allocation4 + $0x54] ss:$8 sps:$4 sm:$0xff]  }
  0x9b   :  { %1354 = vmatprep.subr.bf16.mxu0 %v2652_v46  ;;  %v2727_v46 = vld [vmem:[#allocation2 + $0x36c] ss:$16 sps:$4 sm:$0xff]  }
  0x9d   :  { %1396 = vmatpush1.bf16.msra.mxu1 %v2653_v49  ;;  %v2803_v49 = vld [vmem:[#allocation4 + $0x50] ss:$8 sps:$4 sm:$0xff]  }
  0x9e   :  { %1355 = vmatpush1.bf16.msra.mxu0 %v2650_v48  ;;  %1397 = vmatprep.subr.bf16.mxu1 %v2661_v51  ;;  %v2725_v48 = vld [vmem:[#allocation2 + $0x368] ss:$16 sps:$4 sm:$0xff]   ;;  %v2808_v51 = vld [vmem:[#allocation4 + $0x64] ss:$8 sps:$4 sm:$0xff]  }
  0x9f   :  { %1356 = vmatprep.subr.bf16.mxu0 %v2658_v50  ;;  %v2730_v50 = vld [vmem:[#allocation2 + $0x38c] ss:$16 sps:$4 sm:$0xff]  }
  0xa1   :  { %1398 = vmatpush1.bf16.msra.mxu1 %v2659_v54  ;;  %v2806_v54 = vld [vmem:[#allocation4 + $0x60] ss:$8 sps:$4 sm:$0xff]  }
  0xa2   :  { %1357 = vmatpush1.bf16.msra.mxu0 %v2656_v53  ;;  %1399 = vmatprep.subr.bf16.mxu1 %v2667_v56  ;;  %v2728_v53 = vld [vmem:[#allocation2 + $0x388] ss:$16 sps:$4 sm:$0xff]   ;;  %v2811_v56 = vld [vmem:[#allocation4 + $0x74] ss:$8 sps:$4 sm:$0xff]  }
  0xa3   :  { %1358 = vmatprep.subr.bf16.mxu0 %v2664_v55  ;;  %v2733_v55 = vld [vmem:[#allocation2 + $0x3ac] ss:$16 sps:$4 sm:$0xff]  }
  0xa5   :  { %1400 = vmatpush1.bf16.msra.mxu1 %v2665_v58  ;;  %v2809_v58 = vld [vmem:[#allocation4 + $0x70] ss:$8 sps:$4 sm:$0xff]  }
  0xa6   :  { %1359 = vmatpush1.bf16.msra.mxu0 %v2662_v57  ;;  %1401 = vmatprep.subr.bf16.mxu1 %v2673_v60  ;;  %v2731_v57 = vld [vmem:[#allocation2 + $0x3a8] ss:$16 sps:$4 sm:$0xff]   ;;  %v2814_v60 = vld [vmem:[#allocation4 + $0x84] ss:$8 sps:$4 sm:$0xff]  }
  0xa7   :  { %1360 = vmatprep.subr.bf16.mxu0 %v2670_v59  ;;  %v2736_v59 = vld [vmem:[#allocation2 + $0x3cc] ss:$16 sps:$4 sm:$0xff]  }
  0xa9   :  { %1402 = vmatpush1.bf16.msra.mxu1 %v2671_v62  ;;  %v2812_v62 = vld [vmem:[#allocation4 + $0x80] ss:$8 sps:$4 sm:$0xff]  }
  0xaa   :  { %1361 = vmatpush1.bf16.msra.mxu0 %v2668_v61  ;;  %1403 = vmatprep.subr.bf16.mxu1 %v2679_v0  ;;  %v2734_v61 = vld [vmem:[#allocation2 + $0x3c8] ss:$16 sps:$4 sm:$0xff]   ;;  %v2817_v0 = vld [vmem:[#allocation4 + $0x94] ss:$8 sps:$4 sm:$0xff]  }
  0xab   :  { %1362 = vmatprep.subr.bf16.mxu0 %v2676_v63  ;;  %v2739_v63 = vld [vmem:[#allocation2 + $0x3ec] ss:$16 sps:$4 sm:$0xff]  }
  0xad   :  { %1404 = vmatpush1.bf16.msra.mxu1 %v2677_v2  ;;  %v2815_v2 = vld [vmem:[#allocation4 + $0x90] ss:$8 sps:$4 sm:$0xff]  }
  0xae   :  { %1363 = vmatpush1.bf16.msra.mxu0 %v2674_v1  ;;  %1405 = vmatprep.subr.bf16.mxu1 %v2685_v4  ;;  %v2737_v1 = vld [vmem:[#allocation2 + $0x3e8] ss:$16 sps:$4 sm:$0xff]   ;;  %v2820_v4 = vld [vmem:[#allocation4 + $0xa4] ss:$8 sps:$4 sm:$0xff]  }
  0xaf   :  { %1364 = vmatprep.subr.bf16.mxu0 %v2682_v3  ;;  %v2742_v3 = vld [vmem:[#allocation2 + $0x40c] ss:$16 sps:$4 sm:$0xff]  }
  0xb1   :  { %1406 = vmatpush1.bf16.msra.mxu1 %v2683_v6  ;;  %v2745_v6 = vld [vmem:[#allocation2 + $0x42c] ss:$16 sps:$4 sm:$0xff]  }
  0xb2   :  { %1365 = vmatpush1.bf16.msra.mxu0 %v2680_v5  ;;  %1407 = vmatprep.subr.bf16.mxu1 %v2691_v9  ;;  %v2740_v5 = vld [vmem:[#allocation2 + $0x408] ss:$16 sps:$4 sm:$0xff]   ;;  %v2823_v9 = vld [vmem:[#allocation4 + $0xb4] ss:$8 sps:$4 sm:$0xff]  }
  0xb3   :  { %1366 = vmatprep.subr.bf16.mxu0 %v2688_v7  ;;  %v2818_v7 = vld [vmem:[#allocation4 + $0xa0] ss:$8 sps:$4 sm:$0xff]  }
  0xb5   :  { %1408 = vmatpush1.bf16.msra.mxu1 %v2689_v12  ;;  %v2748_v12 = vld [vmem:[#allocation2 + $0x44c] ss:$16 sps:$4 sm:$0xff]  }
  0xb6   :  { %1367 = vmatpush1.bf16.msra.mxu0 %v2686_v10  ;;  %1418 = vmatprep.subr.bf16.mxu1 %v2694_v14  ;;  %v2743_v10 = vld [vmem:[#allocation2 + $0x428] ss:$16 sps:$4 sm:$0xff]   ;;  %v2826_v14 = vld [vmem:[#allocation4 + $0xc4] ss:$8 sps:$4 sm:$0xff]  }
  0xb7   :  { %1904 = vmatprep.subr.bf16.mxu0 %v2790_v29  ;;  %v2761_v29 = vld [vmem:[#allocation2 + $0x4e8] ss:$16 sps:$4 sm:$0xff]  }
  0xb8   :  { %1410 = vmatmul.mubr.bf16.vlgmr.msra.gmra.mrb[4].mxu1 %v3073_v8  ;;  %v2710_v8 = vld [vmem:[#allocation2 + $0x2c8] ss:$16 sps:$4 sm:$0xff]  }
  0xb9   :  { %1369 = vmatmul.mubr.bf16.vlgmr.msra.gmra.mrb[0].mxu0 %v3089_v15  ;;  %1419 = vmatpush1.bf16.msra.mxu1 %v2692_v16  ;;  %v2746_v16 = vld [vmem:[#allocation2 + $0x448] ss:$16 sps:$4 sm:$0xff]  }
  0xba   :  { %1450 = vmatprep.mubr.bf16.mxu1 %v3063_v52  ;;  %1420 = vmatprep.subr.bf16.mxu1 %v2697_v17  ;;  %v2715_v52 = vld [vmem:[#allocation2 + $0x2ec] ss:$16 sps:$4 sm:$0xff]  }
  0xbb   :  { %1905 = vmatpush1.bf16.msra.mxu0 %v2788_v28  ;;  %v2751_v17 = vld [vmem:[#allocation2 + $0x46c] ss:$16 sps:$4 sm:$0xff]   ;;  %v2833_v28 = vld [vmem:[#allocation4 + $0xf0] ss:$8 sps:$4 sm:$0xff]  }
  0xbc   :  { %1906 = vmatprep.subr.bf16.mxu0 %v2793_v30  ;;  %v2766_v30 = vld [vmem:[#allocation2 + $0x50c] ss:$16 sps:$4 sm:$0xff]  }
  0xbd   :  { %1421 = vmatpush1.bf16.msra.mxu1 %v2695_v18  ;;  %v2824_v18 = vld [vmem:[#allocation4 + $0xc0] ss:$8 sps:$4 sm:$0xff]  }
  0xbe   :  { %1422 = vmatprep.subr.bf16.mxu1 %v2700_v19  ;;  %v2829_v19 = vld [vmem:[#allocation4 + $0xd4] ss:$8 sps:$4 sm:$0xff]  }
  0xbf   :  { %1907 = vmatpush1.bf16.msra.mxu0 %v2791_v32  ;;  %v2764_v32 = vld [vmem:[#allocation2 + $0x508] ss:$16 sps:$4 sm:$0xff]  }
  0xc0   :  { %1908 = vmatprep.subr.bf16.mxu0 %v2796_v34  ;;  %v2767_v34 = vld [vmem:[#allocation2 + $0x528] ss:$16 sps:$4 sm:$0xff]  }
  0xc1   :  { %1423 = vmatpush1.bf16.msra.mxu1 %v2698_v20  ;;  %v2754_v20 = vld [vmem:[#allocation2 + $0x48c] ss:$16 sps:$4 sm:$0xff]  }
  0xc2   :  { %1424 = vmatprep.subr.bf16.mxu1 %v2703_v21  ;;  %v2752_v21 = vld [vmem:[#allocation2 + $0x488] ss:$16 sps:$4 sm:$0xff]  }
  0xc3   :  { %1909 = vmatpush1.bf16.msra.mxu0 %v2794_v37  ;;  %v2770_v37 = vld [vmem:[#allocation2 + $0x548] ss:$16 sps:$4 sm:$0xff]  }
  0xc4   :  { %1910 = vmatprep.subr.bf16.mxu0 %v2799_v39  ;;  %v2773_v39 = vld [vmem:[#allocation2 + $0x568] ss:$16 sps:$4 sm:$0xff]  }
  0xc5   :  { %1425 = vmatpush1.bf16.msra.mxu1 %v2701_v22  ;;  %v2757_v22 = vld [vmem:[#allocation2 + $0x4ac] ss:$16 sps:$4 sm:$0xff]  }
  0xc6   :  { %1426 = vmatprep.subr.bf16.mxu1 %v2706_v23  ;;  %v2755_v23 = vld [vmem:[#allocation2 + $0x4a8] ss:$16 sps:$4 sm:$0xff]  }
  0xc7   :  { %1911 = vmatpush1.bf16.msra.mxu0 %v2797_v41  ;;  %v2776_v41 = vld [vmem:[#allocation2 + $0x588] ss:$16 sps:$4 sm:$0xff]  }
  0xc8   :  { %1912 = vmatprep.subr.bf16.mxu0 %v2802_v43  ;;  %v2779_v43 = vld [vmem:[#allocation2 + $0x5a8] ss:$16 sps:$4 sm:$0xff]  }
  0xc9   :  { %1427 = vmatpush1.bf16.msra.mxu1 %v2704_v24  ;;  %v2760_v24 = vld [vmem:[#allocation2 + $0x4cc] ss:$16 sps:$4 sm:$0xff]  }
  0xca   :  { %1428 = vmatprep.subr.bf16.mxu1 %v2709_v25  ;;  %v2832_v25 = vld [vmem:[#allocation4 + $0xe4] ss:$8 sps:$4 sm:$0xff]  }
  0xcb   :  { %1913 = vmatpush1.bf16.msra.mxu0 %v2800_v45  ;;  %v2782_v45 = vld [vmem:[#allocation2 + $0x5c8] ss:$16 sps:$4 sm:$0xff]  }
  0xcc   :  { %1914 = vmatprep.subr.bf16.mxu0 %v2805_v47  ;;  %v2785_v47 = vld [vmem:[#allocation2 + $0x5e8] ss:$16 sps:$4 sm:$0xff]  }
  0xcd   :  { %1429 = vmatpush1.bf16.msra.mxu1 %v2707_v26  ;;  %v2830_v26 = vld [vmem:[#allocation4 + $0xe0] ss:$8 sps:$4 sm:$0xff]  }
  0xce   :  { %1430 = vmatprep.subr.bf16.mxu1 %v2712_v27  ;;  %v2758_v27 = vld [vmem:[#allocation2 + $0x4c8] ss:$16 sps:$4 sm:$0xff]  }
  0xcf   :  { %1915 = vmatpush1.bf16.msra.mxu0 %v2803_v49 }
  0xd0   :  { %1916 = vmatprep.subr.bf16.mxu0 %v2808_v51 }
  0xd1   :  { %1431 = vmatpush1.bf16.msra.mxu1 %v2710_v8  ;;  %v2763_v8 = vld [vmem:[#allocation2 + $0x4ec] ss:$16 sps:$4 sm:$0xff]  }
  0xd2   :  { %1432 = vmatprep.subr.bf16.mxu1 %v2715_v52  ;;  %v2835_v52 = vld [vmem:[#allocation4 + $0xf4] ss:$8 sps:$4 sm:$0xff]  }
  0xd3   :  { %1917 = vmatpush1.bf16.msra.mxu0 %v2806_v54 }
  0xd4   :  { %1918 = vmatprep.subr.bf16.mxu0 %v2811_v56  ;;  %v3103_v56 = vld [vmem:[%s3131_s2] sm:$0xf] }
  0xd5   :  { %1433 = vmatpush1.bf16.msra.mxu1 %v2713_v31  ;;  %v2838_v31 = vld [vmem:[#allocation4 + $0x104] ss:$8 sps:$4 sm:$0xff]  }
  0xd6   :  { %1434 = vmatprep.subr.bf16.mxu1 %v2718_v33  ;;  %v2769_v33 = vld [vmem:[#allocation2 + $0x52c] ss:$16 sps:$4 sm:$0xff]  }
  0xd7   :  { %1919 = vmatpush1.bf16.msra.mxu0 %v2809_v58 }
  0xd8   :  { %1920 = vmatprep.subr.bf16.mxu0 %v2814_v60 }
  0xd9   :  { %1435 = vmatpush1.bf16.msra.mxu1 %v2716_v36  ;;  %v2772_v36 = vld [vmem:[#allocation2 + $0x54c] ss:$16 sps:$4 sm:$0xff]  }
  0xda   :  { %1436 = vmatprep.subr.bf16.mxu1 %v2721_v38  ;;  %v2775_v38 = vld [vmem:[#allocation2 + $0x56c] ss:$16 sps:$4 sm:$0xff]  }
  0xdb   :  { %1921 = vmatpush1.bf16.msra.mxu0 %v2812_v62 }
  0xdc   :  { %1922 = vmatprep.subr.bf16.mxu0 %v2817_v0 }
  0xdd   :  { %1437 = vmatpush1.bf16.msra.mxu1 %v2719_v40  ;;  %v2778_v40 = vld [vmem:[#allocation2 + $0x58c] ss:$16 sps:$4 sm:$0xff]  }
  0xde   :  { %1438 = vmatprep.subr.bf16.mxu1 %v2724_v42  ;;  %v2781_v42 = vld [vmem:[#allocation2 + $0x5ac] ss:$16 sps:$4 sm:$0xff]  }
  0xdf   :  { %1923 = vmatpush1.bf16.msra.mxu0 %v2815_v2 }
  0xe0   :  { %1924 = vmatprep.subr.bf16.mxu0 %v2820_v4 }
  0xe1   :  { %1439 = vmatpush1.bf16.msra.mxu1 %v2722_v44  ;;  %v2784_v44 = vld [vmem:[#allocation2 + $0x5cc] ss:$16 sps:$4 sm:$0xff]  }
  0xe2   :  { %1440 = vmatprep.subr.bf16.mxu1 %v2727_v46  ;;  %v2787_v46 = vld [vmem:[#allocation2 + $0x5ec] ss:$16 sps:$4 sm:$0xff]  }
  0xe3   :  { %1925 = vmatpush1.bf16.msra.mxu0 %v2818_v7 }
  0xe4   :  { %1926 = vmatprep.subr.bf16.mxu0 %v2823_v9  ;;  %v2841_v9 = vld [vmem:[#allocation4 + $0x114] ss:$8 sps:$4 sm:$0xff]  }
  0xe5   :  { %1441 = vmatpush1.bf16.msra.mxu1 %v2725_v48 }
  0xe6   :  { %1442 = vmatprep.subr.bf16.mxu1 %v2730_v50 }
  0xe7   :  { %1927 = vmatpush1.bf16.msra.mxu0 %v2821_v13  ;;  %v2886_v13 = vld [vmem:[#allocation6 + $0x48] sm:$0xff]  }
  0xe8   :  { %1928 = vmatprep.subr.bf16.mxu0 %v2826_v14  ;;  %v2839_v14 = vld [vmem:[#allocation4 + $0x110] ss:$8 sps:$4 sm:$0xff]  }
  0xe9   :  { %1443 = vmatpush1.bf16.msra.mxu1 %v2728_v53  ;;  %v274_v53 = vlaneseq }
  0xea   :  { %1444 = vmatprep.subr.bf16.mxu1 %v2733_v55 }
  0xeb   :  { %1929 = vmatpush1.bf16.msra.mxu0 %v2824_v18  ;;  %v3097_v54 = vshrl.u32 %v274_v53, 7  ;;  %v2888_v18 = vld [vmem:[#allocation6 + $0x50] sm:$0xff]  }
  0xec   :  { %1930 = vmatprep.subr.bf16.mxu0 %v2829_v19  ;;  %v2842_v19 = vld [vmem:[#allocation4 + $0x120] ss:$8 sps:$4 sm:$0xff]  }
  0xed   :  { %1445 = vmatpush1.bf16.msra.mxu1 %v2731_v57  ;;  %v276_v55 = vsub.s32 0, %v3097_v54  ;;  %v280_v57 = vsub.s32 1, %v3097_v54 }
  0xee   :  { %1446 = vmatprep.subr.bf16.mxu1 %v2736_v59 }
  0xef   :  { %v281_v58 = vrot.slane %v3103_v56, %v280_v57 }
  0xf1   :  { %1447 = vmatpush1.bf16.msra.mxu1 %v2734_v61 }
  0xf2   :  { %1448 = vmatprep.subr.bf16.mxu1 %v2739_v63 }
  0xf5   :  { %1449 = vmatpush1.bf16.msra.mxu1 %v2737_v1 }
  0xf6   :  { %1459 = vmatprep.subr.bf16.mxu1 %v2742_v3 }
  0xf8   :  { %1451 = vmatmul.mubr.bf16.vlgmr.msra.gmra.mrb[4].mxu1 %v3075_v11  ;;  %v2749_v11 = vld [vmem:[#allocation2 + $0x468] ss:$16 sps:$4 sm:$0xff]  }
  0xf9   :  { %1460 = vmatpush1.bf16.msra.mxu1 %v2740_v5  ;;  %1491 = vmatprep.mubr.bf16.mxu1 %v3083_v35  ;;  %v2827_v35 = vld [vmem:[#allocation4 + $0xd0] ss:$8 sps:$4 sm:$0xff]  }
  0xfa   :  { %1461 = vmatprep.subr.bf16.mxu1 %v2745_v6  ;;  %1931 = vmatpush1.bf16.msra.mxu0 %v2827_v35  ;;  %v2836_v6 = vld [vmem:[#allocation4 + $0x100] ss:$8 sps:$4 sm:$0xff]   ;;  %v2890_v35 = vld [vmem:[#allocation6 + $0x58] sm:$0xff]  }
  0xfb   :  { %1932 = vmatprep.subr.bf16.mxu0 %v2832_v25  ;;  %v2848_v25 = vld [vmem:[#allocation4 + $0x140] ss:$8 sps:$4 sm:$0xff]  }
  0xfd   :  { %1462 = vmatpush1.bf16.msra.mxu1 %v2743_v10  ;;  %v2884_v10 = vld [vmem:[#allocation6 + $0x40] sm:$0xff]  }
  0xfe   :  { %1463 = vmatprep.subr.bf16.mxu1 %v2748_v12  ;;  %1933 = vmatpush1.bf16.msra.mxu0 %v2830_v26  ;;  %v2885_v12 = vld [vmem:[#allocation6] sm:$0xff]   ;;  %v2853_v26 = vld [vmem:[#allocation4 + $0x154] ss:$8 sps:$4 sm:$0xff]  }
  0xff   :  { %1934 = vmatprep.subr.bf16.mxu0 %v2835_v52  ;;  %v2851_v52 = vld [vmem:[#allocation4 + $0x150] ss:$8 sps:$4 sm:$0xff]  }
 0x101   :  { %1464 = vmatpush1.bf16.msra.mxu1 %v2746_v16  ;;  %v2844_v16 = vld [vmem:[#allocation4 + $0x124] ss:$8 sps:$4 sm:$0xff]  }
 0x102   :  { %1465 = vmatprep.subr.bf16.mxu1 %v2751_v17  ;;  %1935 = vmatpush1.bf16.msra.mxu0 %v2833_v28  ;;  %v2887_v17 = vld [vmem:[#allocation6 + $0x8] sm:$0xff]  }
 0x103   :  { %1945 = vmatprep.subr.bf16.mxu0 %v2838_v31  ;;  %v2856_v28 = vld [vmem:[#allocation4 + $0x164] ss:$8 sps:$4 sm:$0xff]   ;;  %v2859_v31 = vld [vmem:[#allocation4 + $0x174] ss:$8 sps:$4 sm:$0xff]  }
 0x105   :  { %1466 = vmatpush1.bf16.msra.mxu1 %v2749_v11  ;;  %v2847_v11 = vld [vmem:[#allocation4 + $0x134] ss:$8 sps:$4 sm:$0xff]  }
 0x106   :  { %1467 = vmatprep.subr.bf16.mxu1 %v2754_v20  ;;  %v2889_v20 = vld [vmem:[#allocation6 + $0x10] sm:$0xff]  }
 0x109   :  { %1468 = vmatpush1.bf16.msra.mxu1 %v2752_v21  ;;  %v2845_v21 = vld [vmem:[#allocation4 + $0x130] ss:$8 sps:$4 sm:$0xff]  }
 0x10a   :  { %1469 = vmatprep.subr.bf16.mxu1 %v2757_v22  ;;  %v2850_v22 = vld [vmem:[#allocation4 + $0x144] ss:$8 sps:$4 sm:$0xff]  }
 0x10d   :  { %1470 = vmatpush1.bf16.msra.mxu1 %v2755_v23  ;;  %v2891_v23 = vld [vmem:[#allocation6 + $0x18] sm:$0xff]  }
 0x10e   :  { %1471 = vmatprep.subr.bf16.mxu1 %v2760_v24  ;;  %v2892_v24 = vld [vmem:[#allocation6 + $0x60] sm:$0xff]  }
 0x111   :  { %1472 = vmatpush1.bf16.msra.mxu1 %v2758_v27  ;;  %v2893_v27 = vld [vmem:[#allocation6 + $0x20] sm:$0xff]  }
 0x112   :  { %1473 = vmatprep.subr.bf16.mxu1 %v2763_v8  ;;  %v2894_v8 = vld [vmem:[#allocation6 + $0x68] sm:$0xff]  }
 0x115   :  { %1474 = vmatpush1.bf16.msra.mxu1 %v2761_v29  ;;  %v2895_v29 = vld [vmem:[#allocation6 + $0x28] sm:$0xff]  }
 0x116   :  { %1475 = vmatprep.subr.bf16.mxu1 %v2766_v30  ;;  %v2854_v30 = vld [vmem:[#allocation4 + $0x160] ss:$8 sps:$4 sm:$0xff]  }
 0x119   :  { %1476 = vmatpush1.bf16.msra.mxu1 %v2764_v32  ;;  %v2857_v32 = vld [vmem:[#allocation4 + $0x170] ss:$8 sps:$4 sm:$0xff]  }
 0x11a   :  { %1477 = vmatprep.subr.bf16.mxu1 %v2769_v33  ;;  %v2862_v33 = vld [vmem:[#allocation4 + $0x184] ss:$8 sps:$4 sm:$0xff]  }
 0x11d   :  { %1478 = vmatpush1.bf16.msra.mxu1 %v2767_v34  ;;  %v2860_v34 = vld [vmem:[#allocation4 + $0x180] ss:$8 sps:$4 sm:$0xff]  }
 0x11e   :  { %1479 = vmatprep.subr.bf16.mxu1 %v2772_v36  ;;  %v2865_v36 = vld [vmem:[#allocation4 + $0x194] ss:$8 sps:$4 sm:$0xff]  }
 0x121   :  { %1480 = vmatpush1.bf16.msra.mxu1 %v2770_v37  ;;  %v2863_v37 = vld [vmem:[#allocation4 + $0x190] ss:$8 sps:$4 sm:$0xff]  }
 0x122   :  { %1481 = vmatprep.subr.bf16.mxu1 %v2775_v38  ;;  %v2868_v38 = vld [vmem:[#allocation4 + $0x1a4] ss:$8 sps:$4 sm:$0xff]  }
 0x125   :  { %1482 = vmatpush1.bf16.msra.mxu1 %v2773_v39  ;;  %v2866_v39 = vld [vmem:[#allocation4 + $0x1a0] ss:$8 sps:$4 sm:$0xff]  }
 0x126   :  { %1483 = vmatprep.subr.bf16.mxu1 %v2778_v40  ;;  %v2871_v40 = vld [vmem:[#allocation4 + $0x1b4] ss:$8 sps:$4 sm:$0xff]  }
 0x129   :  { %1484 = vmatpush1.bf16.msra.mxu1 %v2776_v41  ;;  %v2869_v41 = vld [vmem:[#allocation4 + $0x1b0] ss:$8 sps:$4 sm:$0xff]  }
 0x12a   :  { %1485 = vmatprep.subr.bf16.mxu1 %v2781_v42  ;;  %v2874_v42 = vld [vmem:[#allocation4 + $0x1c4] ss:$8 sps:$4 sm:$0xff]  }
 0x12d   :  { %1486 = vmatpush1.bf16.msra.mxu1 %v2779_v43  ;;  %v2872_v43 = vld [vmem:[#allocation4 + $0x1c0] ss:$8 sps:$4 sm:$0xff]  }
 0x12e   :  { %1487 = vmatprep.subr.bf16.mxu1 %v2784_v44  ;;  %v2877_v44 = vld [vmem:[#allocation4 + $0x1d4] ss:$8 sps:$4 sm:$0xff]  }
 0x131   :  { %1488 = vmatpush1.bf16.msra.mxu1 %v2782_v45  ;;  %v2875_v45 = vld [vmem:[#allocation4 + $0x1d0] ss:$8 sps:$4 sm:$0xff]  }
 0x132   :  { %1489 = vmatprep.subr.bf16.mxu1 %v2787_v46  ;;  %v2880_v46 = vld [vmem:[#allocation4 + $0x1e4] ss:$8 sps:$4 sm:$0xff]  }
 0x135   :  { %1490 = vmatpush1.bf16.msra.mxu1 %v2785_v47  ;;  %v2878_v47 = vld [vmem:[#allocation4 + $0x1e0] ss:$8 sps:$4 sm:$0xff]  }
 0x136   :  { %2445 = vmatprep.subr.bf16.mxu1 %v2884_v10 }
 0x138   :  { %1492 = vmatmul.mubr.bf16.vlgmr.msra.gmra.mrb[4].mxu1 %v3089_v15  ;;  %v277_v15 = vrot.slane %v3103_v56, %v276_v55 }
 0x139   :  { %2446 = vmatpush3.bf16.msra.mxu1 %v2885_v12 }
 0x13a   :  { %2447 = vmatprep.subr.bf16.mxu1 %v2886_v13 }
 0x13d   :  { %2448 = vmatpush3.bf16.msra.mxu1 %v2887_v17 }
 0x13e   :  { %2449 = vmatprep.subr.bf16.mxu1 %v2888_v18 }
 0x141   :  { %2450 = vmatpush3.bf16.msra.mxu1 %v2889_v20 }
 0x142   :  { %2451 = vmatprep.subr.bf16.mxu1 %v2890_v35 }
 0x145   :  { %2452 = vmatpush3.bf16.msra.mxu1 %v2891_v23 }
 0x146   :  { %2453 = vmatprep.subr.bf16.mxu1 %v2892_v24 }
 0x149   :  { %2454 = vmatpush3.bf16.msra.mxu1 %v2893_v27 }
 0x14a   :  { %2455 = vmatprep.subr.bf16.mxu1 %v2894_v8 }
 0x14b   :  { %v1288_v48 = vpop.f32.mrb[0].mxu1 }
 0x14c   :  { %v1290_v49 = vpop.f32.mrb[1].mxu1  ;;  %v1289_v59 = vadd.f32 %v1288_v48, %v277_v15  ;;  %v2883_v48 = vld [vmem:[#allocation4 + $0x1f4] ss:$8 sps:$4 sm:$0xff]  }
 0x14d   :  { %v1292_v50 = vpop.f32.mrb[2].mxu1  ;;  %v1291_v60 = vadd.f32 %v1290_v49, %v281_v58  ;;  %2456 = vmatpush3.bf16.msra.mxu1 %v2895_v29  ;;  %v2881_v49 = vld [vmem:[#allocation4 + $0x1f0] ss:$8 sps:$4 sm:$0xff]  }
 0x14e   :  { %v1293_v51 = vpop.f32.mrb[3].mxu1  ;;  %v284_v50 = vsub.s32 2, %v3097_v54 }
 0x14f   :  { %v288_v51 = vsub.s32 3, %v3097_v54 }
 0x150   :  { %v285_v53 = vrot.slane %v3103_v56, %v284_v50 }
 0x151   :  { %v289_v15 = vrot.slane %v3103_v56, %v288_v51  ;;  %v1572_v56 = vld [vmem:[%s3133_s4] sm:$0x3] }
 0x152   :  { %v1581_v10 = vrot.slane %v1572_v56, %v280_v57 }
 0x18c   :  { %v1370_v61 = vpop.f32.mrb[0].mxu0 }
 0x18d   :  { %v2468_v62 = vadd.f32 %v1370_v61, %v1289_v59  ;;  %v1372_v63 = vpop.f32.mrb[1].mxu0 }
 0x18e   :  { %v2470_v0 = vadd.f32 %v1372_v63, %v1291_v60  ;;  %v1374_v1 = vpop.f32.mrb[2].mxu0 }
 0x18f   :  { %v1500_v2 = vmax.f32 %v2468_v62, 0.0  ;;  %v1375_v3 = vpop.f32.mrb[3].mxu0 }
 0x190   :  { %v1501_v4 = vmax.f32 %v2470_v0, 0.0 }
 0x191   :  { %v1504_v7 = vpack.c.bf16 %v1500_v2, %v1500_v2 }
 0x192   :  { %v1505_v5 = vpack.c.bf16 %v1501_v4, %v1501_v4  ;;  %v2896_v4 = vld [vmem:[#allocation6 + $0x70] sm:$0xff]  }
 0x193   :  { %2457 = vmatprep.subr.bf16.mxu1 %v2896_v4 }
 0x194   :  { %1936 = vmatprep.mubr.bf16.mxu0 %v1505_v5  ;;  %v2897_v5 = vld [vmem:[#allocation6 + $0x30] sm:$0xff]  }
 0x195   :  { %1937 = vmatmul.mubr.bf16.vlgmr.msra.gmra.mrb[4].mxu0 %v1504_v7  ;;  %2458 = vmatpush3.bf16.msra.mxu1 %v2897_v5  ;;  %v2899_v7 = vld [vmem:[#allocation6 + $0x38] sm:$0xff]  }
 0x196   :  { %1946 = vmatpush1.bf16.msra.mxu0 %v2836_v6  ;;  %v2898_v6 = vld [vmem:[#allocation6 + $0x78] sm:$0xff]  }
 0x197   :  { %1947 = vmatprep.subr.bf16.mxu0 %v2841_v9  ;;  %2459 = vmatprep.subr.bf16.mxu1 %v2898_v6  ;;  %v1577_v9 = vrot.slane %v1572_v56, %v276_v55  ;;  %v2428_v55 = vld [vmem:[%s3135_s6] ss:$0 sm:$0xff] }
 0x199   :  { %2460 = vmatpush3.bf16.msra.mxu1 %v2899_v7 }
 0x19a   :  { %1948 = vmatpush1.bf16.msra.mxu0 %v2839_v14 }
 0x19b   :  { %1949 = vmatprep.subr.bf16.mxu0 %v2844_v16 }
 0x19e   :  { %1950 = vmatpush1.bf16.msra.mxu0 %v2842_v19 }
 0x19f   :  { %1951 = vmatprep.subr.bf16.mxu0 %v2847_v11 }
 0x1a2   :  { %1952 = vmatpush1.bf16.msra.mxu0 %v2845_v21 }
 0x1a3   :  { %1953 = vmatprep.subr.bf16.mxu0 %v2850_v22 }
 0x1a6   :  { %1954 = vmatpush1.bf16.msra.mxu0 %v2848_v25 }
 0x1a7   :  { %1955 = vmatprep.subr.bf16.mxu0 %v2853_v26 }
 0x1aa   :  { %1956 = vmatpush1.bf16.msra.mxu0 %v2851_v52 }
 0x1ab   :  { %1957 = vmatprep.subr.bf16.mxu0 %v2856_v28 }
 0x1ae   :  { %1958 = vmatpush1.bf16.msra.mxu0 %v2854_v30 }
 0x1af   :  { %1959 = vmatprep.subr.bf16.mxu0 %v2859_v31 }
 0x1b2   :  { %1960 = vmatpush1.bf16.msra.mxu0 %v2857_v32 }
 0x1b3   :  { %1961 = vmatprep.subr.bf16.mxu0 %v2862_v33 }
 0x1b6   :  { %1962 = vmatpush1.bf16.msra.mxu0 %v2860_v34 }
 0x1b7   :  { %1963 = vmatprep.subr.bf16.mxu0 %v2865_v36 }
 0x1ba   :  { %1964 = vmatpush1.bf16.msra.mxu0 %v2863_v37 }
 0x1bb   :  { %1965 = vmatprep.subr.bf16.mxu0 %v2868_v38 }
 0x1be   :  { %1966 = vmatpush1.bf16.msra.mxu0 %v2866_v39 }
 0x1bf   :  { %1967 = vmatprep.subr.bf16.mxu0 %v2871_v40 }
 0x1c2   :  { %1968 = vmatpush1.bf16.msra.mxu0 %v2869_v41 }
 0x1c3   :  { %1969 = vmatprep.subr.bf16.mxu0 %v2874_v42 }
 0x1c6   :  { %1970 = vmatpush1.bf16.msra.mxu0 %v2872_v43 }
 0x1c7   :  { %1971 = vmatprep.subr.bf16.mxu0 %v2877_v44 }
 0x1ca   :  { %1972 = vmatpush1.bf16.msra.mxu0 %v2875_v45 }
 0x1cb   :  { %1973 = vmatprep.subr.bf16.mxu0 %v2880_v46 }
 0x1ce   :  { %1974 = vmatpush1.bf16.msra.mxu0 %v2878_v47 }
 0x1cf   :  { %1975 = vmatprep.subr.bf16.mxu0 %v2883_v48 }
 0x1d2   :  { %1976 = vmatpush1.bf16.msra.mxu0 %v2881_v49 }
 0x20b   :  { %v1493_v58 = vpop.f32.mrb[4].mxu1 }
 0x20c   :  { %v2471_v59 = vadd.f32 %v1493_v58, %v285_v53  ;;  %v1495_v60 = vpop.f32.mrb[5].mxu1 }
 0x20d   :  { %v2472_v61 = vadd.f32 %v1495_v60, %v289_v15  ;;  %v1497_v62 = vpop.f32.mrb[6].mxu1 }
 0x20e   :  { %v1502_v63 = vmax.f32 %v2471_v59, 0.0  ;;  %v1498_v0 = vpop.f32.mrb[7].mxu1 }
 0x20f   :  { %v1503_v1 = vmax.f32 %v2472_v61, 0.0 }
 0x210   :  { %v1506_v3 = vpack.c.bf16 %v1502_v63, %v1502_v63 }
 0x211   :  { %v1507_v2 = vpack.c.bf16 %v1503_v1, %v1503_v1 }
 0x213   :  { %1977 = vmatprep.mubr.bf16.mxu0 %v1507_v2 }
 0x214   :  { %1978 = vmatmul.mubr.bf16.vlgmr.msra.gmra.mrb[4].mxu0 %v1506_v3 }
 0x2e7   :  { %v1979_v12 = vpop.f32.mrb[4].mxu0 }
 0x2e8   :  { %v2473_v13 = vadd.f32 %v1979_v12, %v1577_v9  ;;  %v1981_v14 = vpop.f32.mrb[5].mxu0 }
 0x2e9   :  { %v2474_v16 = vadd.f32 %v1981_v14, %v1581_v10  ;;  %v1983_v17 = vpop.f32.mrb[6].mxu0 }
 0x2ea   :  { %v1986_v18 = vmax.f32 %v2473_v13, 0.0  ;;  %v1984_v19 = vpop.f32.mrb[7].mxu0 }
 0x2eb   :  { %v1987_v11 = vmax.f32 %v2474_v16, 0.0 }
 0x2ec   :  { %v1988_v35 = vpack.c.bf16 %v1986_v18, %v1986_v18 }
 0x2ed   :  { %v1989_v20 = vpack.c.bf16 %v1987_v11, %v1987_v11 }
 0x2ef   :  { %2157 = vmatprep.mubr.bf16.mxu1 %v1989_v20 }
 0x2f0   :  { %2158 = vmatmul.mubr.bf16.vlgmr.msra.gmra.mrb[8].mxu1 %v1988_v35 }
 0x3c3   :  { %v2461_v21 = vpop.f32.mrb[8].mxu1 }
 0x3c4   :  { %v2462_v22 = vpop.f32.mrb[9].mxu1 }
 0x3c5   :  { %v2463_v54 = vadd.f32 %v2462_v22, %v2461_v21  ;;  %v2464_v57 = vpop.f32.mrb[10].mxu1 }
 0x3c6   :  { %v2465_v23 = vpop.f32.mrb[11].mxu1 }
 0x3c7   :  { %v2160_v24 = vadd.f32 %v2463_v54, %v2428_v55 }
 0x3c9   :  { %2165 = vst [vmem:[%s3136_s7] sm:$0xff] %v2160_v24 }
 0x3ca   :  { %2170 = vsyncpa [#allocation3], 1 }
 0x3cb   :  { %2171 = vsyncpa [#allocation5], 1 }

</bundles_post_ra>
